<compile_context>
chip_gen: v7x
topology: tpu7x:2x2x1
jax: 0.10.0
libtpu: 0.0.40
codegen_flags: <defaults>
</compile_context>

<pallas_src>
import functools

import jax
import jax.numpy as jnp
import numpy as np
from jax.experimental import pallas as pl
from jax.experimental.pallas import tpu as pltpu

_MIB = 1024 * 1024
_GATHER_DEPTH = 8          # outstanding row DMAs in the HBM-gather pipeline


# ----------------------------------------------------------------------------
# Small helpers
# ----------------------------------------------------------------------------
def _round_up(n, m):
    return ((n + m - 1) // m) * m


def _device_kind():
    try:
        return jax.devices()[0].device_kind.lower()
    except Exception:
        return ""


def _pick_seq_tile(s, cap):
    """Largest multiple-of-8 divisor of s that is <= cap (full s if s % 8)."""
    if s % 8 != 0:
        return s
    t = max(8, min(cap, s))
    t -= t % 8
    while s % t:
        t -= 8
    return t


def _pick_token_tile(n, cap):
    """Multiple-of-8 token tile <= cap; prefers divisors of round_up(n, 8)."""
    n8 = _round_up(n, 8)
    cap = max(8, min(cap, n8))
    cap -= cap % 8
    best, t = 8, cap
    while t >= 8:
        if n8 % t == 0:
            best = t
            break
        t -= 8
    if best < min(128, n8):          # degenerate divisor -> pad tokens instead
        best = cap
    return best, _round_up(n, best)


# ----------------------------------------------------------------------------
# Stateless in-kernel dropout mask (no pltpu.prng_* -> lowers everywhere)
# ----------------------------------------------------------------------------
def _hash_keep_mask(shape, tile_idx, *, seed, rate):
    tt, d = shape
    r = jax.lax.broadcasted_iota(jnp.int32, shape, 0)
    c = jax.lax.broadcasted_iota(jnp.int32, shape, 1)
    lin = r * jnp.int32(d) + c + tile_idx * jnp.int32(tt * d) + jnp.int32(seed)
    x = lin.astype(jnp.uint32)
    # triple32-style integer finalizer: good avalanche, pure VPU int ops.
    x = x ^ (x >> 17)
    x = x * jnp.uint32(0xED5AD4BB)
    x = x ^ (x >> 11)
    x = x * jnp.uint32(0xAC4C1B51)
    x = x ^ (x >> 15)
    x = x * jnp.uint32(0x31848BAB)
    x = x ^ (x >> 14)
    u24 = (x >> 8).astype(jnp.int32)                    # uniform in [0, 2^24)
    thresh = jnp.int32(min(int(rate * float(1 << 24)), (1 << 24) - 1))
    return u24 >= thresh


def _embed_epilogue(rows, pos, *, training, rate, seed, tile_idx):
    y = rows.astype(jnp.float32) + pos
    if training and rate > 0.0:
        keep = _hash_keep_mask(y.shape, tile_idx, seed=seed, rate=rate)
        y = jnp.where(keep, y * jnp.float32(1.0 / (1.0 - rate)),
                      jnp.float32(0.0))
    return y


# ----------------------------------------------------------------------------
# Embed kernel A: small table resident in VMEM, in-VMEM row gather
# ----------------------------------------------------------------------------
def _embed_resident_kernel(ids_ref,      # scalar prefetch: (B*S,) int32 in SMEM
                           pos_ref,      # (TT, D) f32 positional rows
                           wte_ref,      # (V, D) f32 table, resident in VMEM
                           out_ref,      # (TT, D) f32 output tile
                           *, S, TT, V, training, rate, seed):
    b = pl.program_id(0)
    st = pl.program_id(1)
    base = b * S + st * TT
    tile_idx = b * pl.num_programs(1) + st

    @pl.loop(0, TT)
    def _(t):
        idx = jnp.clip(ids_ref[base + t], 0, V - 1)     # torch: clamp(max=V-1)
        out_ref[pl.ds(t, 1), :] = wte_ref[pl.ds(idx, 1), :]

    out_ref[...] = _embed_epilogue(
        out_ref[...], pos_ref[...], training=training, rate=rate, seed=seed,
        tile_idx=tile_idx).astype(out_ref.dtype)


# ----------------------------------------------------------------------------
# Embed kernel B: table in HBM, depth-8 pipelined row-gather DMAs
# ----------------------------------------------------------------------------
def _embed_hbm_kernel(ids_ref,           # scalar prefetch: (B*S,) int32 in SMEM
                      pos_ref,           # (TT, D) f32 positional rows
                      wte_hbm,           # (V, D) table, left in HBM (pl.ANY)
                      out_ref,           # (TT, D) f32 output tile
                      gbuf,              # (TT, D) VMEM gather buffer
                      sem,               # DMA semaphores, shape (_GATHER_DEPTH,)
                      *, S, TT, V, total, training, rate, seed):
    b = pl.program_id(0)
    st = pl.program_id(1)
    base = b * S + st * TT
    tile_idx = b * pl.num_programs(1) + st
    depth = min(_GATHER_DEPTH, TT)

    def start_fetch(t, row):
        pltpu.make_async_copy(wte_hbm.at[row], gbuf.at[t],
                              sem.at[t % depth]).start()

    def wait_fetch(t):
        pltpu.make_async_copy(wte_hbm.at[0], gbuf.at[t],
                              sem.at[t % depth]).wait()

    # Warm up: `depth` row DMAs in flight before consuming any.
    for t in range(depth):
        start_fetch(t, jnp.clip(ids_ref[base + t], 0, V - 1))

    @pl.loop(0, TT)
    def _(t):
        # Read the id of the row we are about to prefetch BEFORE the wait:
        # DMA .wait() breaks SMEM sst->sld forwarding and would stall the
        # next descriptor issue every iteration.
        nxt = t + depth
        safe = jnp.minimum(base + nxt, jnp.int32(total - 1))
        nxt_row = jnp.clip(ids_ref[safe], 0, V - 1)
        wait_fetch(t)

        @pl.when(nxt < TT)
        def _():
            start_fetch(nxt, nxt_row)

    out_ref[...] = _embed_epilogue(
        gbuf[...], pos_ref[...], training=training, rate=rate, seed=seed,
        tile_idx=tile_idx).astype(out_ref.dtype)


def embed_forward(ids, wte, pos_table, *, training=False, rate=0.0, seed=0,
                  seq_tile=256, gather_mode="auto"):
    """ids: (B, S) int, wte: (V, D) f32, pos_table: (L, D) f32 -> (B, S, D) f32."""
    B, S = ids.shape
    V, D = wte.shape

    # Keep ~6 (TT, D) f32 tiles (gbuf + double-buffered pos/out) under ~36 MiB
    # so the kernel also fits v7x's 64 MiB/TC VMEM.
    row_bytes = D * 4
    tt_cap = (36 * _MIB) // (6 * row_bytes)
    tt_cap = max(8, tt_cap - tt_cap % 8)
    TT = _pick_seq_tile(S, min(seq_tile, tt_cap))
    blk_bytes = TT * D * 4
    table_bytes = V * D * wte.dtype.itemsize

    ids_flat = ids.reshape(-1).astype(jnp.int32)         # ids live in SMEM only
    pos_slice = pos_table[:S, :].astype(jnp.float32)     # (S, D)

    resident = (gather_mode == "resident") or (
        gather_mode == "auto"
        and table_bytes <= 12 * _MIB
        and 2 * table_bytes + 5 * blk_bytes <= 40 * _MIB)

    if resident:
        kernel = functools.partial(_embed_resident_kernel, S=S, TT=TT, V=V,
                                   training=training, rate=rate, seed=seed)
        in_specs = [
            pl.BlockSpec((TT, D), lambda b, st, ids: (st, 0)),   # pos rows
            pl.BlockSpec((V, D), lambda b, st, ids: (0, 0)),     # resident table
        ]
        scratch = []
        vmem_need = 2 * table_bytes + 5 * blk_bytes + 2 * _MIB
    else:
        # TODO(synk): also keep a bf16/packed-u32 gather copy of wte to halve
        # per-row DMA bytes on this path.
        kernel = functools.partial(_embed_hbm_kernel, S=S, TT=TT, V=V,
                                   total=B * S, training=training, rate=rate,
                                   seed=seed)
        in_specs = [
            pl.BlockSpec((TT, D), lambda b, st, ids: (st, 0)),   # pos rows
            pl.BlockSpec(memory_space=pl.ANY),                   # table in HBM
        ]
        scratch = [pltpu.VMEM((TT, D), wte.dtype),
                   pltpu.SemaphoreType.DMA((_GATHER_DEPTH,))]
        vmem_need = 6 * blk_bytes + 2 * _MIB

    vmem_limit = int(min(max(32 * _MIB, vmem_need), 48 * _MIB))

    grid_spec = pltpu.PrefetchScalarGridSpec(
        num_scalar_prefetch=1,
        grid=(B, S // TT),
        in_specs=in_specs,
        out_specs=pl.BlockSpec((None, TT, D), lambda b, st, ids: (b, st, 0)),
        scratch_shapes=scratch,
    )
    return pl.pallas_call(
        kernel,
        out_shape=jax.ShapeDtypeStruct((B, S, D), jnp.float32),
        grid_spec=grid_spec,
        compiler_params=pltpu.CompilerParams(
            dimension_semantics=("parallel", "parallel"),
            vmem_limit_bytes=vmem_limit),
    )(ids_flat, pos_slice, wte)


# ----------------------------------------------------------------------------
# Attend kernel: logits = x @ wte.T as a tiled MXU matmul over (tokens, vocab)
# ----------------------------------------------------------------------------
def _attend_kernel(x_ref, wt_ref, out_ref):
    # x already bf16 (cast once in the wrapper); f32 accumulation on the MXU.
    out_ref[...] = jnp.dot(x_ref[...], wt_ref[...],
                           preferred_element_type=jnp.float32
                           ).astype(out_ref.dtype)


def attend_forward(x, wte_t, vocab_size=None, *, token_tile=None,
                   vocab_tile=256):
    """x: (B, S, D) float, wte_t: (D, Vp) bf16 (vocab 128-padded) -> (B, S, V) f32."""
    B, S, D = x.shape
    Dw, Vp = wte_t.shape
    assert Dw == D
    V_out = Vp if vocab_size is None else vocab_size
    N = B * S

    # Never stream a (D, V) weight block: keep vocab lane-dense multiples of 128.
    if Vp % 128 != 0:
        wte_t = jnp.pad(wte_t, ((0, 0), (0, _round_up(Vp, 128) - Vp)))
        Vp = wte_t.shape[1]
    tv = vocab_tile if (vocab_tile <= Vp and Vp % vocab_tile == 0) else 128
    if Vp % tv != 0:                 # only possible when Vp < 128
        tv = Vp

    # Per-generation token tile: v6e has 2x the VMEM and a higher ridge point.
    kind = _device_kind()
    if token_tile is None:
        token_tile = 1024 if "v6" in kind else 512

    w_bytes = wte_t.dtype.itemsize
    x_bytes = w_bytes                              # activations cast to weight dtype
    budget = 44 * _MIB                             # fits v7x's 64 MiB/TC VMEM
    ts_cap = (budget // 2 - D * tv * w_bytes) // (D * x_bytes + tv * 4)
    ts_cap = max(8, ts_cap - ts_cap % 8)
    ts, n_pad = _pick_token_tile(N, min(token_tile, ts_cap))

    # Cast once here: the x block is reused across the whole vocab axis, so an
    # in-kernel cast would be repeated Vp/tv times per token tile.
    x2 = x.reshape(N, D).astype(wte_t.dtype)
    if n_pad != N:
        x2 = jnp.pad(x2, ((0, n_pad - N), (0, 0)))

    working = 2 * (ts * D * x_bytes + D * tv * w_bytes + ts * tv * 4)
    vmem_limit = int(min(max(32 * _MIB, working + 4 * _MIB), 56 * _MIB))

    # TODO(synk): for very large D, add a K grid axis ("arbitrary", last) with
    # an f32 VMEM accumulator + pl.when init/finalize.
    out2 = pl.pallas_call(
        _attend_kernel,
        out_shape=jax.ShapeDtypeStruct((n_pad, Vp), jnp.float32),
        grid=(n_pad // ts, Vp // tv),              # vocab last: x block re-used
        in_specs=[
            pl.BlockSpec((ts, D), lambda i, j: (i, 0)),   # bf16 token tile
            pl.BlockSpec((D, tv), lambda i, j: (0, j)),   # streamed weight tile
        ],
        out_specs=pl.BlockSpec((ts, tv), lambda i, j: (i, j)),
        compiler_params=pltpu.CompilerParams(
            dimension_semantics=("parallel", "parallel"),
            vmem_limit_bytes=vmem_limit),
        cost_estimate=pl.CostEstimate(
            flops=2 * n_pad * D * Vp,
            transcendentals=0,
            bytes_accessed=(n_pad * D * x_bytes
                            + (n_pad // ts) * D * Vp * w_bytes
                            + n_pad * Vp * 4)),
    )(x2, wte_t)
    return out2[:N, :V_out].reshape(B, S, V_out)


# ----------------------------------------------------------------------------
# Module (parameter setup = glue)
# ----------------------------------------------------------------------------
def make_sinusoidal_pe(max_len, dim):
    position = jnp.arange(max_len, dtype=jnp.float32)[:, None]
    div_term = jnp.exp(jnp.arange(0, dim, 2, dtype=jnp.float32)
                       * (-jnp.log(10000.0) / dim))
    sin = jnp.sin(position * div_term)
    cos = jnp.cos(position * div_term)
    return jnp.stack([sin, cos], axis=-1).reshape(max_len, dim)


class EmbeddingPallas:
    def __init__(self, vocab_size, embedding_dim, max_pos_emb_length,
                 positional_embedding_type="sinusoidal",
                 residual_dropout_rate=0.1, key=None,
                 attend_weight_dtype=jnp.bfloat16):
        if key is None:
            key = jax.random.PRNGKey(0)
        k_wte, k_wpe = jax.random.split(key)
        self.vocab_size = vocab_size
        self.embedding_dim = embedding_dim
        self.rate = residual_dropout_rate
        # nn.Embedding default init: N(0, 1). Gather master kept f32.
        self.wte = jax.random.normal(k_wte, (vocab_size, embedding_dim),
                                     dtype=jnp.float32)
        # Attend copy: pre-transposed once to (D, V) bf16 (contraction dim on
        # sublanes, vocab lane-dense) and vocab padded to a multiple of 128 so
        # the kernel never streams a (D, V) block.
        v_pad = _round_up(vocab_size, 128)
        wt = jnp.asarray(self.wte.T, dtype=attend_weight_dtype)
        if v_pad != vocab_size:
            wt = jnp.pad(wt, ((0, 0), (0, v_pad - vocab_size)))
        self.wte_attend = wt
        if positional_embedding_type == "learned":
            self.pos_table = jax.random.normal(
                k_wpe, (max_pos_emb_length, embedding_dim), dtype=jnp.float32)
        elif positional_embedding_type == "sinusoidal":
            self.pos_table = make_sinusoidal_pe(max_pos_emb_length, embedding_dim)
        else:
            raise ValueError(
                f"Unknown positional embedding type: {positional_embedding_type}")

    def forward(self, batch, training, attend=False, dropout_seed=0):
        if attend:
            inputs = batch.pop("x")
            batch["logits"] = attend_forward(inputs, self.wte_attend,
                                             vocab_size=self.vocab_size)
        else:
            batch["x"] = embed_forward(
                batch["inputs"], self.wte, self.pos_table,
                training=training, rate=self.rate, seed=dropout_seed)
        return batch


# ----------------------------------------------------------------------------
# Demo / check
# ----------------------------------------------------------------------------
if __name__ == "__main__":
    V, D, MAX_LEN = 512, 128, 64
    B, S = 2, 8

    key = jax.random.PRNGKey(0)
    k_ids, k_x, k_params = jax.random.split(key, 3)

    mod = EmbeddingPallas(vocab_size=V, embedding_dim=D,
                          max_pos_emb_length=MAX_LEN,
                          positional_embedding_type="sinusoidal",
                          residual_dropout_rate=0.1, key=k_params)

    ids = jax.random.randint(k_ids, (B, S), 0, V + 17, dtype=jnp.int32)  # > V-1 tests clamp
    x_in = jax.random.normal(k_x, (B, S, D), dtype=jnp.float32)

    ids_c = jnp.clip(ids, 0, V - 1)
    emb_ref = mod.wte[ids_c] + mod.pos_table[:S][None, :, :]

    # --- embed path, resident-table fast path (eval: dropout = identity) ---
    batch = mod.forward({"inputs": ids}, training=False, attend=False)
    emb_out = jax.block_until_ready(batch["x"])
    np.testing.assert_allclose(np.asarray(emb_out), np.asarray(emb_ref),
                               rtol=1e-5, atol=1e-5)

    # --- embed path, forced HBM DMA-gather path (large-table code path) ---
    emb_hbm = jax.block_until_ready(
        embed_forward(ids, mod.wte, mod.pos_table, training=False,
                      rate=mod.rate, gather_mode="hbm"))
    np.testing.assert_allclose(np.asarray(emb_hbm), np.asarray(emb_ref),
                               rtol=1e-5, atol=1e-5)

    # --- embed path (training: exercises in-kernel dropout) ---
    batch_tr = mod.forward({"inputs": ids}, training=True, attend=False)
    emb_tr = jax.block_until_ready(batch_tr["x"])
    assert emb_tr.shape == (B, S, D)
    assert np.all(np.isfinite(np.asarray(emb_tr)))
    zero_frac = float(np.mean(np.asarray(emb_tr) == 0.0))
    assert 0.0 < zero_frac < 0.5, f"unexpected dropout zero fraction {zero_frac}"

    # --- attend path: logits = x @ wte.T (bf16 weights/acts, f32 accumulation) ---
    batch2 = mod.forward({"x": x_in}, training=False, attend=True)
    logits = jax.block_until_ready(batch2["logits"])
    x_bf = x_in.astype(jnp.bfloat16).astype(jnp.float32)
    w_f32 = mod.wte_attend.astype(jnp.float32)[:, :V]                # (D, V)
    logits_ref = jnp.einsum("bsd,dv->bsv", x_bf, w_f32,
                            precision=jax.lax.Precision.HIGHEST)
    np.testing.assert_allclose(np.asarray(logits), np.asarray(logits_ref),
                               rtol=1e-3, atol=1e-3)

    assert emb_out.shape == (B, S, D)
    assert logits.shape == (B, S, V)
    print("KERNEL_OK")
</pallas_src>

<mosaic_0001>
module attributes {stable_mosaic.version = 11 : i64} {
  func.func @_embed_resident_kernel(%arg0: i32, %arg1: i32, %arg2: memref<16xi32, #tpu.memory_space<smem>>, %arg3: memref<8x128xf32, #tpu.memory_space<vmem>>, %arg4: memref<512x128xf32, #tpu.memory_space<vmem>>, %arg5: memref<1x8x128xf32, #tpu.memory_space<vmem>>) attributes {dimension_semantics = [#tpu.dimension_semantics<parallel>, #tpu.dimension_semantics<parallel>], iteration_bounds = array<i64: 2, 1>, scalar_prefetch = 1 : i64, scratch_operands = 0 : i64, tpu.core_type = #tpu.core_type<tc>, window_params = [{transform_indices = @transform_0, window_bounds = array<i64: 8, 128>}, {pipeline_mode = #tpu.pipeline_mode<synchronous>, transform_indices = @transform_1, window_bounds = array<i64: 512, 128>}, {transform_indices = @transform_2, window_bounds = array<i64: 1, 8, 128>}]} {
    %c8_i32 = arith.constant 8 : i32
    %0 = arith.muli %arg0, %c8_i32 : i32
    %c8_i32_0 = arith.constant 8 : i32
    %1 = arith.muli %arg1, %c8_i32_0 : i32
    %2 = arith.addi %0, %1 : i32
    %c0_i32 = arith.constant 0 : i32
    %c8_i32_1 = arith.constant 8 : i32
    %3 = arith.addi %c0_i32, %c8_i32_1 : i32
    %c1_i32 = arith.constant 1 : i32
    scf.for %arg6 = %c0_i32 to %3 step %c1_i32  : i32 {
      %c1_i32_10 = arith.constant 1 : i32
      %11 = arith.muli %arg6, %c1_i32_10 : i32
      %c0_i32_11 = arith.constant 0 : i32
      %12 = arith.addi %c0_i32_11, %11 : i32
      %13 = arith.addi %2, %12 : i32
      %14 = arith.index_cast %13 : i32 to index
      %15 = memref.load %arg2[%14] : memref<16xi32, #tpu.memory_space<smem>>
      %c0_i32_12 = arith.constant 0 : i32
      %c511_i32 = arith.constant 511 : i32
      %16 = arith.maxsi %c0_i32_12, %15 : i32
      %17 = arith.minsi %c511_i32, %16 : i32
      %18 = arith.index_cast %17 : i32 to index
      %c0_13 = arith.constant 0 : index
      %19 = vector.load %arg4[%18, %c0_13] : memref<512x128xf32, #tpu.memory_space<vmem>>, vector<1x128xf32>
      %c0_14 = arith.constant 0 : index
      %20 = arith.index_cast %12 : i32 to index
      %c0_15 = arith.constant 0 : index
      %21 = vector.load %arg5[%c0_14, %20, %c0_15] : memref<1x8x128xf32, #tpu.memory_space<vmem>>, vector<1x1x128xf32>
      %22 = vector.shape_cast %21 : vector<1x1x128xf32> to vector<1x128xf32>
      %23 = vector.shape_cast %19 : vector<1x128xf32> to vector<1x1x128xf32>
      tpu.vector_store %arg5[%c0_14, %20, %c0_15], %23 {strides = array<i32>} : memref<1x8x128xf32, #tpu.memory_space<vmem>>, vector<1x1x128xf32>,
    }
    %c8_i32_2 = arith.constant 8 : i32
    %c0 = arith.constant 0 : index
    %c0_3 = arith.constant 0 : index
    %c0_4 = arith.constant 0 : index
    %4 = vector.load %arg5[%c0, %c0_3, %c0_4] : memref<1x8x128xf32, #tpu.memory_space<vmem>>, vector<1x8x128xf32>
    %5 = vector.shape_cast %4 : vector<1x8x128xf32> to vector<8x128xf32>
    %c0_5 = arith.constant 0 : index
    %c0_6 = arith.constant 0 : index
    %6 = vector.load %arg3[%c0_5, %c0_6] : memref<8x128xf32, #tpu.memory_space<vmem>>, vector<8x128xf32>
    %7 = arith.addf %5, %6 : vector<8x128xf32>
    %c0_7 = arith.constant 0 : index
    %c0_8 = arith.constant 0 : index
    %c0_9 = arith.constant 0 : index
    %8 = vector.load %arg5[%c0_7, %c0_8, %c0_9] : memref<1x8x128xf32, #tpu.memory_space<vmem>>, vector<1x8x128xf32>
    %9 = vector.shape_cast %8 : vector<1x8x128xf32> to vector<8x128xf32>
    %10 = vector.shape_cast %7 : vector<8x128xf32> to vector<1x8x128xf32>
    tpu.vector_store %arg5[%c0_7, %c0_8, %c0_9], %10 {strides = array<i32>} : memref<1x8x128xf32, #tpu.memory_space<vmem>>, vector<1x8x128xf32>,
    return
  }
  func.func @transform_0(%arg0: i32, %arg1: i32, %arg2: memref<16xi32, #tpu.memory_space<smem>>) -> (i32, i32) {
    %c0_i32 = arith.constant 0 : i32
    %c0_i32_0 = arith.constant 0 : i32
    return %arg1, %c0_i32 : i32, i32
  }
  func.func @transform_1(%arg0: i32, %arg1: i32, %arg2: memref<16xi32, #tpu.memory_space<smem>>) -> (i32, i32) {
    %c0_i32 = arith.constant 0 : i32
    %c0_i32_0 = arith.constant 0 : i32
    %c0_i32_1 = arith.constant 0 : i32
    return %c0_i32, %c0_i32_0 : i32, i32
  }
  func.func @transform_2(%arg0: i32, %arg1: i32, %arg2: memref<16xi32, #tpu.memory_space<smem>>) -> (i32, i32, i32) {
    %c0_i32 = arith.constant 0 : i32
    %c0_i32_0 = arith.constant 0 : i32
    return %arg0, %arg1, %c0_i32 : i32, i32, i32
  }
}

</mosaic_0001>

<bundles_post_ra>
// kernel: tpu_custom_call.1
= control target key start
LH: loop header
LB: loop body
LE: loop exit
PB: predicated region body
PF: predicated region fallthrough
CT: control target
= control target key end

     0   :  { %s798_s0 = inlined_call_operand.hbm [shape: s32[16], index: 0, kind: input, shape index: {}]   ;;  %s799_s1 = inlined_call_operand.hbm [shape: f32[8,128], index: 1, kind: input, shape index: {}]   ;;  %s800_s2 = inlined_call_operand.hbm [shape: f32[512,128], index: 2, kind: input, shape index: {}]   ;;  %s801_s3 = inlined_call_operand.hbm [shape: f32[2,8,128], index: 3, kind: output, shape index: {}]  }
   0x1   :  { %s409_s14 = scalar_lea.hbm %s798_s0, 16 }
   0x2   :  { %p410_p0 = scmp.ne.s32.totalorder %s798_s0, %s409_s14  ;;  %p413_p1 = scmp.lt.u32.totalorder %s409_s14, %s798_s0 }
   0x4   :  { %p415_p2 = pnand %p413_p1, %p410_p0 }
   0x6   :  { %418 = shalt.err (!%p415_p2)  }
   0x7   :  { %s573_s19 = smov [#allocation3]  }
   0x8   :  { %9 = dma.hbm_to_smem %s798_s0, 16, %s573_s19, [#allocation2] }
   0x9   :  { %531 = dma.done.wait [#allocation2], 16 }
   0xa   :  { %532 = vsyncadd [#allocation2], 4294967280 }
   0xb   :  { %11 = sfence }
   0xc   :  { %12 = vsyncpa [#allocation5], 0 }
   0xd   :  { %13 = vsyncpa [#allocation8], 0 }
   0xe   :  { %14 = vsyncpa [#allocation6], 0 }
   0xf   :  { %16 = vsyncpa [#allocation6 + $0x1], 0  ;;  %s611_s22 = smov 0   ;;  %s613_s23 = smov 0  }
  0x10   :  { %s615_s24 = smov 0   ;;  %s617_s25 = smov 0  }
  0x11   :  { %s619_s26 = smov 0   ;;  %s621_s27 = smov 0  }
  0x12 LB: > { %s301_s0 = sadd.s32 4294967295, %s567_s27   ;;  %s302_s28 = sadd.s32 4294967294, %s567_s27   ;;  %s567_s27 = sphi %s621_s27, %s22_s27   ;;  %s563_s26 = sphi %s619_s26, %s819_s26   ;;  %s559_s25 = sphi %s617_s25, %s818_s25   ;;  %s555_s24 = sphi %s615_s24, %s817_s24   ;;  %s551_s23 = sphi %s613_s23, %s816_s23   ;;  %s547_s22 = sphi %s611_s22, %s815_s22  }
  0x13   : > { %s34_s29 = sadd.s32 1, %s563_s26  ;;  %s90_s30 = sadd.s32 1, %s555_s24 }
  0x14   : > { %p36_p3 = scmp.ge.s32.totalorder %s34_s29, 2  ;;  %p100_p4 = scmp.ne.s32.totalorder %s555_s24, %s551_s23 }
  0x15   : > { %p101_p5 = scmp.eq.s32.totalorder %s301_s0, 1  ;;  %p106_p6 = scmp.ne.s32.totalorder %s551_s23, %s547_s22 }
  0x16   : > { %s821_s29 = smov (%p36_p3, %s34_s29), 0  ;;  %p107_p8 = scmp.eq.s32.totalorder %s302_s28, 1 }
  0x17   : > { %p651_p7 = por %p101_p5, %p100_p4  ;;  %s85_s5 = ssub.s32 %s563_s26, %s821_s29 }
  0x18   : > { %p303_p9 = scmp.ge.s32.totalorder %s567_s27, 1  ;;  %p88_p10 = scmp.eq.s32.totalorder %s85_s5, 0 }
  0x19   : > { %s806_s4 = scalar_select %p651_p7, 1, 0 }
  0x1a   : > { %p658_p11 = por %p107_p8, %p106_p6  ;;  %p114_p12 = scmp.lt.s32.totalorder %s567_s27, 3 }
  0x1b   : > { %s664_s7 = scalar_select %p88_p10, %s555_s24, %s90_s30  }
  0x1c   : > { %s807_s6 = scalar_select %p658_p11, 1, 0 }
  0x1d   : > { %p666_p13 = pnand %p303_p9, %p114_p12  ;;  %p670_p0 = scmp.eq.s32.totalorder %s301_s0, 0 }
  0x1e   : > { %s574_s10 = smov [#allocation4]   ;;  %s575_s12 = smov [#allocation7]  }
  0x1f   : > { %s808_s8 = scalar_select %p666_p13, 1, 0 }
  0x20   : > { %s809_s9 = scalar_select %p670_p0, 1, 0 }
  0x21   : > { %p332_p1 = pneg %p666_p13  ;;  %s129_s11 = sshll.u32 %s574_s10, 4  ;;  %s130_s11 = int_to_ptr.vmem [resolvable:$true] %s129_s11 }
  0x22   : > { %s139_s13 = sshll.u32 %s575_s12, 4  ;;  %s419_s17 = scalar_lea.hbm %s799_s1, 128  ;;  %s682_s13 = int_to_ptr.vmem [resolvable:$true] %s139_s13 }
  0x23   : > { %p678_p2 = pnand %p670_p0, %p332_p1  ;;  %p420_p3 = scmp.ne.s32.totalorder %s799_s1, %s419_s17 }
  0x24   : > { %p426_p8 = scmp.lt.u32.totalorder %s419_s17, %s799_s1 }
  0x25   : > { %p421_p4 = pneg %p678_p2 }
  0x27   : > { %p422_p5 = pnand %p421_p4, %p420_p3 }
  0x29   : > { %p423_p6 = pneg %p422_p5 }
  0x2b   : > { %p428_p9 = pnand %p426_p8, %p423_p6 }
  0x2d   : > { %431 = shalt.err (!%p428_p9)
}
  0x2e   : > { %s432_s0 = scalar_lea.vmem %s130_s11, 128  ;;  %p440_p11 = scmp.lt.s32.totalorder %s130_s11, %s130_s11 }
  0x2f   : > { %p433_p10 = scmp.ne.s32.totalorder %s130_s11, %s432_s0  ;;  %p441_p7 = scmp.lt.s32.totalorder %s432_s0, %s432_s0 }
  0x31   : > { %p435_p12 = pnand %p433_p10, %p421_p4  ;;  %p442_p0 = por %p441_p7, %p440_p11 }
  0x33   : > { %p436_p1 = pneg %p435_p12 }
  0x35   : > { %p443_p13 = pnand %p442_p0, %p436_p1 }
  0x37   : > { %446 = shalt.err (!%p443_p13)
}
  0x38   : > { %335 = dma.hbm_to_vmem [thread:$0]  (!%p678_p2), %s799_s1, 128, %s130_s11, [#allocation5]  }
  0x39   : > { %s447_s12 = scalar_lea.hbm %s800_s2, 8192 }
  0x3a   : > { %p448_p3 = scmp.ne.s32.totalorder %s800_s2, %s447_s12  ;;  %p454_p13 = scmp.lt.u32.totalorder %s447_s12, %s800_s2 }
  0x3c   : > { %p450_p7 = pnand %p448_p3, %p421_p4 }
  0x3e   : > { %p451_p11 = pneg %p450_p7 }
  0x40   : > { %p456_p0 = pnand %p454_p13, %p451_p11 }
  0x42   : > { %459 = shalt.err (!%p456_p0)
}
  0x43   : > { %s460_s11 = scalar_lea.vmem %s682_s13, 8192  ;;  %p468_p9 = scmp.lt.s32.totalorder %s682_s13, %s682_s13 }
  0x44   : > { %p461_p5 = scmp.ne.s32.totalorder %s682_s13, %s460_s11  ;;  %p469_p10 = scmp.lt.s32.totalorder %s460_s11, %s460_s11 }
  0x46   : > { %p463_p6 = pnand %p461_p5, %p421_p4  ;;  %p470_p12 = por %p469_p10, %p468_p9 }
  0x48   : > { %p464_p8 = pneg %p463_p6 }
  0x4a   : > { %p471_p1 = pnand %p470_p12, %p464_p8 }
  0x4c   : > { %474 = shalt.err (!%p471_p1)
}
  0x4d   : > { %s576_s19 = smov 128   ;;  %s577_s20 = smov 8  }
  0x4e   : > { %338 = dma.hbm_to_vmem [thread:$0]  (!%p678_p2), %s800_s2, 8192, %s682_s13, [#allocation8], %s576_s19, %s576_s19, %s577_s20  }
  0x4f   : > { %p811_p3 = scmp.ne.s32.totalorder %s808_s8, 0 }
  0x50   : > { %p812_p4 = scmp.ne.s32.totalorder (!%p811_p3), %s809_s9, 0 }
  0x51   : > { %155 = sbr.rel (%p811_p3) target bundleno = 131 (0x83), region = 28 }
  0x58   : > { %534 = dma.done.wait (%p812_p4), [#allocation5], 128  }
  0x59   : > { %536 = vsyncadd (%p812_p4), [#allocation5], 4294967168 }
  0x5a   : > { %538 = dma.done.wait (%p812_p4), [#allocation8], 8192  }
  0x5b   : > { %540 = vsyncadd (%p812_p4), [#allocation8], 4294959104  ;;  %s173_s14 = sand.u32 1, %s551_s23   ;;  %s310_s13 = sshll.u32 %s559_s25, 3 }
  0x5c   : > { %s309_s8 = sshll.u32 %s173_s14, 3  ;;  %s569_s30 = smov 0  }
  0x5d   : > { %s175_s28 = scalar_lea.vmem [#allocation9], %s309_s8 }
  0x5e LB: >> { %s185_s5 = sadd.s32 %s571_s30, %s310_s13  ;;  %s193_s9 = scalar_lea.vmem %s175_s28, %s571_s30 [#allocation9]  ;;  %s571_s30 = sphi %s569_s30, %s184_s30  }
  0x5f   : >> { %s186_s10 = sld [smem:[#allocation3 + %s185_s5]]  ;;  %s184_s30 = sadd.s32 1, %s571_s30  }
  0x60   : >> { %p181_p11 = scmp.ge.s32.totalorder %s184_s30, 8  }
  0x61   : > { %v196_v2 = vld [vmem:[#allocation4] sm:$0xff] (%p181_p11)  ;;  %s317_s15 = sshll.u32 (%p181_p11), %s559_s25, 7  ;;  %s214_s11 = sshll.u32 (%p181_p11), %s175_s28, 4  ;;  %s751_s11 = int_to_ptr.vmem [resolvable:$true] %s214_s11 }
  0x62   : > { %s749_s18 = scalar_lea.hbm (%p181_p11), %s801_s3, %s317_s15  ;;  %s200_s19 = scalar_lea.sflag (%p181_p11), [#allocation6], %s173_s14 }
  0x63   : > { %s475_s20 = scalar_lea.vmem (%p181_p11), %s751_s11, 128  ;;  %p813_p0 = scmp.ne.s32.totalorder (%p181_p11), %s806_s4, 0 }
  0x64   : > { %p476_p13 = scmp.ne.s32.totalorder (%p181_p11), %s751_s11, %s475_s20  ;;  %s578_s25 = smov (%p181_p11), [#allocation9]  }
  0x65   : >> { %p187_p2 = scmp.gt.s32.totalorder %s186_s10, 0  ;;  %p311_p7 = scmp.lt.s32.totalorder %s186_s10, 511 }
  0x66   : > { %183 = sbr.rel (!%p181_p11) target bundleno = 94 (0x5e), region = 79  ;;  %p477_p5 = pnand (%p181_p11), %p476_p13, %p813_p0 }
  0x67   : >> { %s823_s10 = smov (!%p187_p2, %s186_s10), 0  ;;  %s479_s21 = sshll.u32 (%p181_p11), %s578_s25, 4  ;;  %s480_s21 = int_to_ptr.vmem [resolvable:$false] %s479_s21 }
  0x68   : >> { %s825_s10 = smov (!%p311_p7, %s823_s10), 511  ;;  %p478_p6 = pneg (%p181_p11), %p477_p5 }
  0x69   : >> { %s191_s12 = scalar_lea.vmem [#allocation7], %s825_s10  ;;  %s481_s0 = scalar_lea.vmem (%p181_p11), %s480_s21, 256 }
  0x6a   : >> { %v192_v0 = vld [vmem:[%s191_s12] sm:$0x1]  ;;  %p482_p8 = scmp.lt.s32.totalorder (%p181_p11), %s751_s11, %s480_s21  ;;  %p483_p9 = scmp.lt.s32.totalorder (%p181_p11), %s481_s0, %s475_s20 }
  0x6b   : >> { %194 = vst [vmem:[%s193_s9] sm:$0x1] %v192_v0 }
  0x6c   : > { %p484_p10 = por (%p181_p11), %p483_p9, %p482_p8 }
  0x6e   : > { %p485_p12 = pnand %p484_p10, %p478_p6 }
  0x72   : > { %v195_v1 = vld [vmem:[%s175_s28] sm:$0xff] }
  0x73   : > { %v197_v3 = vadd.f32 %v196_v2, %v195_v1 }
  0x75   : > { %198 = vst [vmem:[%s175_s28] sm:$0xff] %v197_v3 }
  0x76   : > { %488 = shalt.err (!%p485_p12)
}
  0x77   : > { %s489_s14 = scalar_lea.hbm %s749_s18, 128  ;;  %s493_s28 = scalar_lea.hbm %s801_s3, 256 }
  0x78   : > { %p490_p1 = scmp.ne.s32.totalorder %s749_s18, %s489_s14  ;;  %p494_p2 = scmp.lt.u32.totalorder %s749_s18, %s801_s3 }
  0x79   : > { %p495_p7 = scmp.lt.u32.totalorder %s493_s28, %s489_s14  ;;  %p497_p13 = scmp.lt.u32.totalorder %s489_s14, %s749_s18 }
  0x7a   : > { %p491_p3 = pnand %p490_p1, %p813_p0 }
  0x7b   : > { %p496_p11 = por %p495_p7, %p494_p2 }
  0x7c   : > { %p492_p4 = pneg %p491_p3 }
  0x7d   : > { %p498_p5 = por %p497_p13, %p496_p11 }
  0x7f   : > { %p499_p6 = pnand %p498_p5, %p492_p4 }
  0x81   : > { %502 = shalt.err (!%p499_p6)
}
  0x82   : > { %330 = dma.vmem_to_hbm [thread:$0]  (%p813_p0), %s751_s11, 128, %s749_s18, %s200_s19  }
  0x83 PF: > { %p347_p8 = scmp.ge.s32.totalorder %s567_s27, 2  ;;  %s226_s10 = sand.u32 1, %s547_s22  }
  0x84   : > { %p814_p9 = scmp.ne.s32.totalorder %s807_s6, 0  ;;  %s227_s9 = scalar_lea.sflag [#allocation6], %s226_s10 }
  0x86   : > { %p340_p10 = pnand %p347_p8, %p814_p9 }
  0x88   : > { %542 = dma.done.wait (!%p340_p10), %s227_s9, 128  }
  0x89   : > { %544 = vsyncadd (!%p340_p10), %s227_s9, 4294967168  ;;  %s22_s27 = sadd.s32 1, %s567_s27   ;;  %s815_s22 = smov %s551_s23 }
  0x8a   : > { %p19_p12 = scmp.ge.s32.totalorder %s22_s27, 4   ;;  %s816_s23 = smov %s555_s24 }
  0x8b   : > { %s817_s24 = smov %s664_s7  ;;  %s818_s25 = smov %s563_s26 }
  0x8c   : > { %s819_s26 = smov %s821_s29  ;;  %21 = sbr.rel (!%p19_p12) target bundleno = 18 (0x12), region = 90 }
  0x93   :  { %232 = vsyncpa [#allocation5], 1 }
  0x94   :  { %234 = vsyncpa [#allocation5 + $0x1], 1 }
  0x95   :  { %235 = vsyncpa [#allocation8], 1 }
  0x96   :  { %236 = vsyncpa [#allocation6], 1 }
  0x97   :  { %238 = vsyncpa [#allocation6 + $0x1], 1 }

</bundles_post_ra>
